<compile_context>
chip_gen: v7x
topology: tpu7x:2x2x1
jax: 0.10.0
libtpu: 0.0.40
codegen_flags: <defaults>
</compile_context>

<pallas_src>
import functools

import jax
import jax.numpy as jnp
from jax.experimental import pallas as pl
from jax.experimental.pallas import tpu as pltpu

_SUBLANE = 8
_LANE = 128
_TM_MAX = 256          # max rows per M tile
_TK_CANDIDATES = (1024, 512, 256, 128)   # K tile sizes (multiples of 128)


def _round_up(x, m):
    return ((x + m - 1) // m) * m


def _choose_tk(k_pad):
    """Largest K tile from the candidate list that exactly divides k_pad."""
    for cand in _TK_CANDIDATES:
        if k_pad % cand == 0:
            return cand
    return _LANE  # unreachable: k_pad is always a multiple of 128


def _linear_kernel(x_ref, w_ref, b_ref, o_ref, acc_ref):
    # x_ref: (tm, tk)      flattened-input tile
    # w_ref: (tk, n_pad)   pre-transposed weight tile (zero-padded K/N tails)
    # b_ref: (1, n_pad)    bias (zero-padded N tail)
    # o_ref: (tm, n_pad)   output tile (f32)
    # acc_ref: (tm, n_pad) f32 accumulator (VMEM scratch)
    k = pl.program_id(1)

    @pl.when(k == 0)
    def _():
        acc_ref[...] = jnp.zeros_like(acc_ref)

    acc_ref[...] += jnp.dot(
        x_ref[...], w_ref[...], preferred_element_type=jnp.float32
    )

    @pl.when(k == pl.num_programs(1) - 1)
    def _():
        o_ref[...] = (acc_ref[...] + b_ref[...]).astype(o_ref.dtype)


def prepare_params(weight, bias, *, use_bf16=False):
    """One-time parameter prep (hoisted out of the hot path).

    weight: (num_classes, num_features) float32 (PyTorch Linear convention)
    bias:   (num_classes,) float32
    Returns:
      w_t: (k_pad, n_pad)  weight.T, zero-padded, optionally bf16
      b_p: (1, n_pad)      bias, zero-padded, f32
    """
    num_classes, num_features = weight.shape
    n_pad = _round_up(max(num_classes, _LANE), _LANE)
    k_pad = _round_up(num_features, _LANE)

    param_dtype = jnp.bfloat16 if use_bf16 else jnp.float32

    w_t = jnp.zeros((k_pad, n_pad), jnp.float32)
    w_t = w_t.at[:num_features, :num_classes].set(weight.T.astype(jnp.float32))
    w_t = w_t.astype(param_dtype)

    b_p = jnp.zeros((1, n_pad), jnp.float32)
    b_p = b_p.at[0, :num_classes].set(bias.astype(jnp.float32))
    return w_t, b_p


@functools.partial(jax.jit, static_argnames=("num_classes",))
def neural_network_forward(x_nchw, w_t, b_p, *, num_classes):
    """Forward pass: Flatten(NCHW) + Linear, Linear in a Pallas TPU kernel."""
    n = x_nchw.shape[0]
    k = x_nchw.shape[1] * x_nchw.shape[2] * x_nchw.shape[3]
    k_pad, n_pad = w_t.shape
    tk = _choose_tk(k_pad)
    tm = min(_TM_MAX, _round_up(max(n, _SUBLANE), _SUBLANE))

    # Flatten (glue) — same element ordering as torch.nn.Flatten on NCHW.
    x_flat = x_nchw.reshape(n, k).astype(w_t.dtype)
    if k_pad != k:
        # Only taken when num_features is not 128-aligned; keeps the K tail
        # contributions exactly zero (matches the zero-padded weight rows).
        x_flat = jnp.pad(x_flat, ((0, 0), (0, k_pad - k)))

    m_tiles = pl.cdiv(n, tm)
    k_tiles = k_pad // tk

    itemsize = jnp.dtype(w_t.dtype).itemsize
    vmem_est = (
        2 * (tm * tk + tk * n_pad) * itemsize  # double-buffered X / W tiles
        + 2 * tm * n_pad * 4                   # double-buffered output tile
        + tm * n_pad * 4                       # accumulator scratch
        + 2 * n_pad * 4                        # bias
    )
    vmem_limit = int(min(32 * 1024 * 1024, max(16 * 1024 * 1024, 2 * vmem_est)))

    cost = pl.CostEstimate(
        flops=2 * n * k_pad * n_pad,
        transcendentals=0,
        bytes_accessed=(n * k_pad + k_pad * n_pad) * itemsize + n * n_pad * 4,
    )

    out_p = pl.pallas_call(
        _linear_kernel,
        out_shape=jax.ShapeDtypeStruct((n, n_pad), jnp.float32),
        grid_spec=pltpu.PrefetchScalarGridSpec(
            num_scalar_prefetch=0,
            grid=(m_tiles, k_tiles),
            in_specs=[
                pl.BlockSpec((tm, tk), lambda i, kk: (i, kk)),
                pl.BlockSpec((tk, n_pad), lambda i, kk: (kk, 0)),
                pl.BlockSpec((1, n_pad), lambda i, kk: (0, 0)),
            ],
            out_specs=pl.BlockSpec((tm, n_pad), lambda i, kk: (i, 0)),
            scratch_shapes=[pltpu.VMEM((tm, n_pad), jnp.float32)],
        ),
        compiler_params=pltpu.CompilerParams(
            dimension_semantics=("parallel", "arbitrary"),
            vmem_limit_bytes=vmem_limit,
        ),
        cost_estimate=cost,
    )(x_flat, w_t, b_p)

    return out_p[:, :num_classes]


def init_params(key, num_features, num_classes):
    """Deterministic init mimicking PyTorch nn.Linear default (uniform ±1/sqrt(fan_in))."""
    kw, kb = jax.random.split(key)
    bound = 1.0 / jnp.sqrt(jnp.float32(num_features))
    weight = jax.random.uniform(kw, (num_classes, num_features), jnp.float32, -bound, bound)
    bias = jax.random.uniform(kb, (num_classes,), jnp.float32, -bound, bound)
    return weight, bias


if __name__ == "__main__":
    key = jax.random.PRNGKey(0)
    k_x, k_p = jax.random.split(key)

    # Small shapes consistent with the module: batch=2, channels=4, spatial=16.
    batch, channels, height, width = 2, 4, 16, 16
    num_features = channels * height * width  # 1024
    num_classes = 10

    x = jax.random.normal(k_x, (batch, channels, height, width), jnp.float32)
    weight, bias = init_params(k_p, num_features, num_classes)

    # One-time parameter prep (hoisted out of the per-call path).
    w_t, b_p = prepare_params(weight, bias, use_bf16=False)

    logits = neural_network_forward(x, w_t, b_p, num_classes=num_classes)
    jax.block_until_ready(logits)

    # Sanity check against pure-JAX reference.
    ref = x.reshape(batch, num_features) @ weight.T + bias
    assert logits.shape == (batch, num_classes)
    assert jnp.allclose(logits, ref, atol=1e-4, rtol=1e-4)

    print("KERNEL_OK")
</pallas_src>

<mosaic_0001>
module attributes {stable_mosaic.version = 11 : i64} {
  func.func @_linear_kernel(%arg0: i32, %arg1: i32, %arg2: memref<8x1024xf32, #tpu.memory_space<vmem>>, %arg3: memref<1024x128xf32, #tpu.memory_space<vmem>>, %arg4: memref<1x128xf32, #tpu.memory_space<vmem>>, %arg5: memref<8x128xf32, #tpu.memory_space<vmem>>, %arg6: memref<8x128xf32, #tpu.memory_space<vmem>>) attributes {dimension_semantics = [#tpu.dimension_semantics<parallel>, #tpu.dimension_semantics<arbitrary>], iteration_bounds = array<i64: 1, 1>, scalar_prefetch = 0 : i64, scratch_operands = 1 : i64, tpu.core_type = #tpu.core_type<tc>, window_params = [{transform_indices = @transform_0, window_bounds = array<i64: 8, 1024>}, {transform_indices = @transform_1, window_bounds = array<i64: 1024, 128>}, {pipeline_mode = #tpu.pipeline_mode<synchronous>, transform_indices = @transform_2, window_bounds = array<i64: 1, 128>}, {transform_indices = @transform_3, window_bounds = array<i64: 8, 128>}]} {
    %c0_i32 = arith.constant 0 : i32
    %0 = arith.cmpi eq, %arg1, %c0_i32 : i32
    %1 = arith.extui %0 : i1 to i32
    %c0_i32_0 = arith.constant 0 : i32
    %2 = arith.cmpi ne, %1, %c0_i32_0 : i32
    scf.if %2 {
      %cst_10 = arith.constant 0.000000e+00 : f32
      %12 = vector.broadcast %cst_10 : f32 to vector<8x128xf32>
      %c0_11 = arith.constant 0 : index
      %c0_12 = arith.constant 0 : index
      %13 = vector.load %arg6[%c0_11, %c0_12] : memref<8x128xf32, #tpu.memory_space<vmem>>, vector<8x128xf32>
      tpu.vector_store %arg6[%c0_11, %c0_12], %12 {strides = array<i32>} : memref<8x128xf32, #tpu.memory_space<vmem>>, vector<8x128xf32>,
    } else {
    }
    %c0 = arith.constant 0 : index
    %c0_1 = arith.constant 0 : index
    %3 = vector.load %arg6[%c0, %c0_1] : memref<8x128xf32, #tpu.memory_space<vmem>>, vector<8x128xf32>
    %c0_2 = arith.constant 0 : index
    %c0_3 = arith.constant 0 : index
    %4 = vector.load %arg2[%c0_2, %c0_3] : memref<8x1024xf32, #tpu.memory_space<vmem>>, vector<8x1024xf32>
    %c0_4 = arith.constant 0 : index
    %c0_5 = arith.constant 0 : index
    %5 = vector.load %arg3[%c0_4, %c0_5] : memref<1024x128xf32, #tpu.memory_space<vmem>>, vector<1024x128xf32>
    %cst = arith.constant dense<0.000000e+00> : vector<8x128xf32>
    %6 = tpu.matmul %4, %5, %cst {dimension_numbers = #tpu.dot_dimension_numbers<[1], [0], [0], [1], [0, 0, 1, 1], [], []>} : vector<8x1024xf32>, vector<1024x128xf32>, vector<8x128xf32> -> vector<8x128xf32>
    %7 = arith.addf %3, %6 : vector<8x128xf32>
    %c0_6 = arith.constant 0 : index
    %c0_7 = arith.constant 0 : index
    %8 = vector.load %arg6[%c0_6, %c0_7] : memref<8x128xf32, #tpu.memory_space<vmem>>, vector<8x128xf32>
    tpu.vector_store %arg6[%c0_6, %c0_7], %7 {strides = array<i32>} : memref<8x128xf32, #tpu.memory_space<vmem>>, vector<8x128xf32>,
    %c0_i32_8 = arith.constant 0 : i32
    %9 = arith.cmpi eq, %arg1, %c0_i32_8 : i32
    %10 = arith.extui %9 : i1 to i32
    %c0_i32_9 = arith.constant 0 : i32
    %11 = arith.cmpi ne, %10, %c0_i32_9 : i32
    scf.if %11 {
      %c0_10 = arith.constant 0 : index
      %c0_11 = arith.constant 0 : index
      %12 = vector.load %arg6[%c0_10, %c0_11] : memref<8x128xf32, #tpu.memory_space<vmem>>, vector<8x128xf32>
      %c0_12 = arith.constant 0 : index
      %c0_13 = arith.constant 0 : index
      %13 = vector.load %arg4[%c0_12, %c0_13] : memref<1x128xf32, #tpu.memory_space<vmem>>, vector<1x128xf32>
      %14 = vector.broadcast %13 : vector<1x128xf32> to vector<8x128xf32>
      %15 = arith.addf %12, %14 : vector<8x128xf32>
      %c0_14 = arith.constant 0 : index
      %c0_15 = arith.constant 0 : index
      %16 = vector.load %arg5[%c0_14, %c0_15] : memref<8x128xf32, #tpu.memory_space<vmem>>, vector<8x128xf32>
      tpu.vector_store %arg5[%c0_14, %c0_15], %15 {strides = array<i32>} : memref<8x128xf32, #tpu.memory_space<vmem>>, vector<8x128xf32>,
    } else {
    }
    return
  }
  func.func @transform_0(%arg0: i32, %arg1: i32) -> (i32, i32) {
    %c0_i32 = arith.constant 0 : i32
    return %arg0, %arg1 : i32, i32
  }
  func.func @transform_1(%arg0: i32, %arg1: i32) -> (i32, i32) {
    %c0_i32 = arith.constant 0 : i32
    %c0_i32_0 = arith.constant 0 : i32
    return %arg1, %c0_i32 : i32, i32
  }
  func.func @transform_2(%arg0: i32, %arg1: i32) -> (i32, i32) {
    %c0_i32 = arith.constant 0 : i32
    %c0_i32_0 = arith.constant 0 : i32
    %c0_i32_1 = arith.constant 0 : i32
    return %c0_i32, %c0_i32_0 : i32, i32
  }
  func.func @transform_3(%arg0: i32, %arg1: i32) -> (i32, i32) {
    %c0_i32 = arith.constant 0 : i32
    %c0_i32_0 = arith.constant 0 : i32
    return %arg0, %c0_i32 : i32, i32
  }
}

</mosaic_0001>

<bundles_post_ra>
// kernel: neural_network_forward.1
= control target key start
LH: loop header
LB: loop body
LE: loop exit
PB: predicated region body
PF: predicated region fallthrough
CT: control target
= control target key end

     0   :  { %8 = vsyncpa [#allocation4], 0  ;;  %s995_s0 = inlined_call_operand.vmem [shape: f32[2,1024], index: 0, kind: input, shape index: {}]   ;;  %s996_s1 = inlined_call_operand.hbm [shape: f32[1024,128], index: 1, kind: input, shape index: {}]   ;;  %s997_s2 = inlined_call_operand.vmem [shape: f32[1,128], index: 2, kind: input, shape index: {}]   ;;  %s998_s3 = inlined_call_operand.hbm [shape: f32[2,128], index: 3, kind: output, shape index: {}]  }
   0x1   :  { %9 = vsyncpa [#allocation5], 0  ;;  %s907_s12 = smov [#allocation3]   ;;  %s859_s16 = scalar_lea.hbm %s996_s1, 16384 }
   0x2   :  { %s17_s13 = sshll.u32 %s907_s12, 4  ;;  %p860_p0 = scmp.ne.s32.totalorder %s996_s1, %s859_s16  ;;  %s18_s13 = int_to_ptr.vmem [resolvable:$true] %s17_s13 }
   0x3   :  { %p863_p1 = scmp.lt.u32.totalorder %s859_s16, %s996_s1 }
   0x5   :  { %p865_p2 = pnand %p863_p1, %p860_p0 }
   0x7   :  { %868 = shalt.err (!%p865_p2)
}
   0x8   :  { %s869_s21 = scalar_lea.vmem %s18_s13, 16384  ;;  %p874_p4 = scmp.lt.s32.totalorder %s18_s13, %s18_s13 }
   0x9   :  { %p870_p3 = scmp.ne.s32.totalorder %s18_s13, %s869_s21  ;;  %p875_p5 = scmp.lt.s32.totalorder %s869_s21, %s869_s21 }
   0xb   :  { %p876_p6 = por %p875_p5, %p874_p4 }
   0xd   :  { %p877_p7 = pnand %p876_p6, %p870_p3 }
   0xf   :  { %880 = shalt.err (!%p877_p7)
}
  0x10   :  { %s908_s22 = smov 128   ;;  %s909_s23 = smov 8  }
  0x11   :  { %23 = dma.hbm_to_vmem [thread:$0]  %s996_s1, 16384, %s18_s13, [#allocation4], %s908_s22, %s908_s22, %s909_s23  }
  0x12   :  { %903 = dma.done.wait [#allocation4], 16384  }
  0x13   :  { %904 = vsyncadd [#allocation4], 4294950912  ;;  %v59_v0 = vld [vmem:[#allocation3 + $0x80] sm:$0xff]  ;;  %v60_v1 = vld [vmem:[#allocation3 + $0x88] sm:$0xff]  ;;  %v910_v51 = vmov 1983009808   ;;  %v186_v53 = vlaneseq }
  0x14   :  { %v91_v2 = vld [vmem:[#allocation3 + $0x180] sm:$0xff]  ;;  %v712_v3 = vpack.c.bf16 %v60_v1, %v59_v0  ;;  %v92_v4 = vld [vmem:[#allocation3 + $0x188] sm:$0xff]  ;;  %v61_v11 = vld [vmem:[#allocation3 + $0x90] sm:$0xff]  ;;  %v184_v52 = vunpack.c.l.s4 %v910_v51 }
  0x15   :  { %v43_v5 = vld [vmem:[#allocation3] sm:$0xff]  ;;  %v44_v6 = vld [vmem:[#allocation3 + $0x8] sm:$0xff]  ;;  %v744_v7 = vpack.c.bf16 %v92_v4, %v91_v2  ;;  %v62_v13 = vld [vmem:[#allocation3 + $0x98] sm:$0xff] }
  0x16   :  { %v714_v8 = vpack.c.bf16 %v44_v6, %v43_v5  ;;  %v75_v9 = vld [vmem:[#allocation3 + $0x100] sm:$0xff]  ;;  %v76_v10 = vld [vmem:[#allocation3 + $0x108] sm:$0xff]  ;;  %713 = vmatprep.subr.bf16.mxu0 %v712_v3  ;;  %v93_v14 = vld [vmem:[#allocation3 + $0x190] sm:$0xff]  ;;  %v716_v16 = vpack.c.bf16 %v62_v13, %v61_v11  ;;  %v185_v4 = vunpack.c.0.s8 %v184_v52  ;;  %v187_v5 = vshrl.u32 %v186_v53, 7 }
  0x17   :  { %v746_v12 = vpack.c.bf16 %v76_v10, %v75_v9  ;;  %v94_v15 = vld [vmem:[#allocation3 + $0x198] sm:$0xff]  ;;  %745 = vmatprep.subr.bf16.mxu1 %v744_v7  ;;  %v45_v18 = vld [vmem:[#allocation3 + $0x10] sm:$0xff]  ;;  %v63_v23 = vld [vmem:[#allocation3 + $0xa0] sm:$0xff] }
  0x18   :  { %715 = vmatpush3.bf16.msra.mxu0 %v714_v8  ;;  %v748_v17 = vpack.c.bf16 %v94_v15, %v93_v14  ;;  %v46_v19 = vld [vmem:[#allocation3 + $0x18] sm:$0xff]  ;;  %v77_v20 = vld [vmem:[#allocation3 + $0x110] sm:$0xff]  ;;  %v64_v24 = vld [vmem:[#allocation3 + $0xa8] sm:$0xff] }
  0x19   :  { %747 = vmatpush3.bf16.msra.mxu1 %v746_v12  ;;  %v718_v21 = vpack.c.bf16 %v46_v19, %v45_v18  ;;  %v78_v22 = vld [vmem:[#allocation3 + $0x118] sm:$0xff]  ;;  %717 = vmatprep.subr.bf16.mxu0 %v716_v16  ;;  %v720_v26 = vpack.c.bf16 %v64_v24, %v63_v23  ;;  %v95_v27 = vld [vmem:[#allocation3 + $0x1a0] sm:$0xff]  ;;  %v96_v28 = vld [vmem:[#allocation3 + $0x1a8] sm:$0xff] }
  0x1a   :  { %749 = vmatprep.subr.bf16.mxu1 %v748_v17  ;;  %v750_v25 = vpack.c.bf16 %v78_v22, %v77_v20  ;;  %v47_v29 = vld [vmem:[#allocation3 + $0x20] sm:$0xff]  ;;  %v752_v30 = vpack.c.bf16 %v96_v28, %v95_v27  ;;  %v48_v31 = vld [vmem:[#allocation3 + $0x28] sm:$0xff]  ;;  %v65_v35 = vld [vmem:[#allocation3 + $0xb0] sm:$0xff]  ;;  %v946_v22 = vsub.s32 %v185_v4, %v187_v5 }
  0x1b   :  { %v79_v32 = vld [vmem:[#allocation3 + $0x120] sm:$0xff]  ;;  %v80_v33 = vld [vmem:[#allocation3 + $0x128] sm:$0xff]  ;;  %v722_v34 = vpack.c.bf16 %v48_v31, %v47_v29  ;;  %v66_v36 = vld [vmem:[#allocation3 + $0xb8] sm:$0xff] }
  0x1c   :  { %719 = vmatpush3.bf16.msra.mxu0 %v718_v21  ;;  %v97_v37 = vld [vmem:[#allocation3 + $0x1b0] sm:$0xff]  ;;  %v754_v38 = vpack.c.bf16 %v80_v33, %v79_v32  ;;  %v724_v39 = vpack.c.bf16 %v66_v36, %v65_v35  ;;  %v98_v40 = vld [vmem:[#allocation3 + $0x1b8] sm:$0xff]  ;;  %v67_v46 = vld [vmem:[#allocation3 + $0xc0] sm:$0xff] }
  0x1d   :  { %751 = vmatpush3.bf16.msra.mxu1 %v750_v25  ;;  %721 = vmatprep.subr.bf16.mxu0 %v720_v26  ;;  %v49_v41 = vld [vmem:[#allocation3 + $0x30] sm:$0xff]  ;;  %v50_v42 = vld [vmem:[#allocation3 + $0x38] sm:$0xff]  ;;  %v756_v43 = vpack.c.bf16 %v98_v40, %v97_v37  ;;  %v68_v47 = vld [vmem:[#allocation3 + $0xc8] sm:$0xff] }
  0x1e   :  { %753 = vmatprep.subr.bf16.mxu1 %v752_v30  ;;  %v81_v44 = vld [vmem:[#allocation3 + $0x130] sm:$0xff]  ;;  %v82_v45 = vld [vmem:[#allocation3 + $0x138] sm:$0xff]  ;;  %v99_v48 = vld [vmem:[#allocation3 + $0x1c0] sm:$0xff]  ;;  %v726_v50 = vpack.c.bf16 %v50_v42, %v49_v41  ;;  %v728_v55 = vpack.c.bf16 %v68_v47, %v67_v46 }
  0x1f   :  { %v100_v49 = vld [vmem:[#allocation3 + $0x1c8] sm:$0xff]  ;;  %v758_v54 = vpack.c.bf16 %v82_v45, %v81_v44  ;;  %v51_v56 = vld [vmem:[#allocation3 + $0x40] sm:$0xff]  ;;  %v69_v61 = vld [vmem:[#allocation3 + $0xd0] sm:$0xff] }
  0x20   :  { %723 = vmatpush3.bf16.msra.mxu0 %v722_v34  ;;  %v52_v57 = vld [vmem:[#allocation3 + $0x48] sm:$0xff]  ;;  %v83_v58 = vld [vmem:[#allocation3 + $0x140] sm:$0xff]  ;;  %v760_v59 = vpack.c.bf16 %v100_v49, %v99_v48  ;;  %v70_v62 = vld [vmem:[#allocation3 + $0xd8] sm:$0xff] }
  0x21   :  { %755 = vmatpush3.bf16.msra.mxu1 %v754_v38  ;;  %725 = vmatprep.subr.bf16.mxu0 %v724_v39  ;;  %v84_v60 = vld [vmem:[#allocation3 + $0x148] sm:$0xff]  ;;  %v101_v63 = vld [vmem:[#allocation3 + $0x1d0] sm:$0xff]  ;;  %v102_v0 = vld [vmem:[#allocation3 + $0x1d8] sm:$0xff]  ;;  %v730_v1 = vpack.c.bf16 %v52_v57, %v51_v56  ;;  %v732_v7 = vpack.c.bf16 %v70_v62, %v69_v61 }
  0x22   :  { %757 = vmatprep.subr.bf16.mxu1 %v756_v43  ;;  %v53_v2 = vld [vmem:[#allocation3 + $0x50] sm:$0xff]  ;;  %v54_v3 = vld [vmem:[#allocation3 + $0x58] sm:$0xff]  ;;  %v762_v6 = vpack.c.bf16 %v84_v60, %v83_v58  ;;  %v71_v10 = vld [vmem:[#allocation3 + $0xe0] sm:$0xff]  ;;  %v764_v11 = vpack.c.bf16 %v102_v0, %v101_v63 }
  0x23   :  { %v85_v8 = vld [vmem:[#allocation3 + $0x150] sm:$0xff]  ;;  %v86_v9 = vld [vmem:[#allocation3 + $0x158] sm:$0xff]  ;;  %v72_v12 = vld [vmem:[#allocation3 + $0xe8] sm:$0xff]  ;;  %v734_v18 = vpack.c.bf16 %v54_v3, %v53_v2 }
  0x24   :  { %727 = vmatpush3.bf16.msra.mxu0 %v726_v50  ;;  %v103_v13 = vld [vmem:[#allocation3 + $0x1e0] sm:$0xff]  ;;  %v104_v14 = vld [vmem:[#allocation3 + $0x1e8] sm:$0xff]  ;;  %v73_v20 = vld [vmem:[#allocation3 + $0xf0] sm:$0xff]  ;;  %v766_v23 = vpack.c.bf16 %v86_v9, %v85_v8  ;;  %v736_v24 = vpack.c.bf16 %v72_v12, %v71_v10 }
  0x25   :  { %759 = vmatpush3.bf16.msra.mxu1 %v758_v54  ;;  %729 = vmatprep.subr.bf16.mxu0 %v728_v55  ;;  %v55_v15 = vld [vmem:[#allocation3 + $0x60] sm:$0xff]  ;;  %v56_v16 = vld [vmem:[#allocation3 + $0x68] sm:$0xff]  ;;  %v74_v21 = vld [vmem:[#allocation3 + $0xf8] sm:$0xff]  ;;  %v768_v27 = vpack.c.bf16 %v104_v14, %v103_v13 }
  0x26   :  { %761 = vmatprep.subr.bf16.mxu1 %v760_v59  ;;  %v87_v17 = vld [vmem:[#allocation3 + $0x160] sm:$0xff]  ;;  %v88_v19 = vld [vmem:[#allocation3 + $0x168] sm:$0xff]  ;;  %v105_v25 = vld [vmem:[#allocation3 + $0x1f0] sm:$0xff]  ;;  %v738_v32 = vpack.c.bf16 %v56_v16, %v55_v15  ;;  %v740_v34 = vpack.c.bf16 %v74_v21, %v73_v20 }
  0x27   :  { %v106_v26 = vld [vmem:[#allocation3 + $0x1f8] sm:$0xff]  ;;  %v847_v28 = vld [vmem:[%s995_s0] ss:$16 sps:$4 sm:$0xff]   ;;  %v851_v30 = vld [vmem:[%s995_s0 + $0x4] ss:$16 sps:$4 sm:$0xff]   ;;  %v770_v33 = vpack.c.bf16 %v88_v19, %v87_v17 }
  0x28   :  { %731 = vmatpush3.bf16.msra.mxu0 %v730_v1  ;;  %v849_v29 = vld [vmem:[%s995_s0 + $0x20] ss:$16 sps:$4 sm:$0xff]   ;;  %v852_v31 = vld [vmem:[%s995_s0 + $0x24] ss:$16 sps:$4 sm:$0xff]   ;;  %v189_v35 = vrot.slane %v847_v28, %v946_v22  ;;  %v58_v37 = vld [vmem:[#allocation3 + $0x78] sm:$0xff]  ;;  %v196_v40 = vrot.slane %v851_v30, %v946_v22  ;;  %v772_v42 = vpack.c.bf16 %v106_v26, %v105_v25 }
  0x29   :  { %763 = vmatpush3.bf16.msra.mxu1 %v762_v6  ;;  %733 = vmatprep.subr.bf16.mxu0 %v732_v7  ;;  %v57_v36 = vld [vmem:[#allocation3 + $0x70] sm:$0xff]  ;;  %v203_v39 = vrot.slane %v849_v29, %v946_v22  ;;  %v210_v41 = vrot.slane %v852_v31, %v946_v22  ;;  %v90_v43 = vld [vmem:[#allocation3 + $0x178] sm:$0xff]  ;;  %v123_v44 = vld [vmem:[#allocation3 + $0x280] sm:$0xff] }
  0x2a   :  { %765 = vmatprep.subr.bf16.mxu1 %v764_v11  ;;  %v89_v38 = vld [vmem:[#allocation3 + $0x170] sm:$0xff]  ;;  %v124_v45 = vld [vmem:[#allocation3 + $0x288] sm:$0xff]  ;;  %v155_v48 = vld [vmem:[#allocation3 + $0x380] sm:$0xff]  ;;  %v742_v50 = vpack.c.bf16 %v58_v37, %v57_v36 }
  0x2b   :  { %v212_v46 = vcombine.high %v189_v35, %v203_v39  ;;  %v214_v47 = vcombine.high %v196_v40, %v210_v41  ;;  %v156_v49 = vld [vmem:[#allocation3 + $0x388] sm:$0xff]  ;;  %v774_v51 = vpack.c.bf16 %v90_v43, %v89_v38  ;;  %v776_v52 = vpack.c.bf16 %v124_v45, %v123_v44  ;;  %v107_v53 = vld [vmem:[#allocation3 + $0x200] sm:$0xff]  ;;  %v125_v58 = vld [vmem:[#allocation3 + $0x290] sm:$0xff] }
  0x2c   :  { %735 = vmatpush3.bf16.msra.mxu0 %v734_v18  ;;  %v108_v54 = vld [vmem:[#allocation3 + $0x208] sm:$0xff]  ;;  %v139_v55 = vld [vmem:[#allocation3 + $0x300] sm:$0xff]  ;;  %v808_v56 = vpack.c.bf16 %v156_v49, %v155_v48  ;;  %v126_v59 = vld [vmem:[#allocation3 + $0x298] sm:$0xff]  ;;  %v211_v60 = vcombine.low %v189_v35, %v203_v39  ;;  %v213_v63 = vcombine.low %v196_v40, %v210_v41 }
  0x2d   :  { %767 = vmatpush3.bf16.msra.mxu1 %v766_v23  ;;  %737 = vmatprep.subr.bf16.mxu0 %v736_v24  ;;  %v140_v57 = vld [vmem:[#allocation3 + $0x308] sm:$0xff]  ;;  %v157_v61 = vld [vmem:[#allocation3 + $0x390] sm:$0xff]  ;;  %v158_v62 = vld [vmem:[#allocation3 + $0x398] sm:$0xff]  ;;  %v778_v0 = vpack.c.bf16 %v108_v54, %v107_v53  ;;  %v780_v2 = vpack.c.bf16 %v126_v59, %v125_v58 }
  0x2e   :  { %769 = vmatprep.subr.bf16.mxu1 %v768_v27  ;;  %323 = vmatprep.mubr.f32.mxu0 %v212_v46  ;;  %v810_v1 = vpack.c.bf16 %v140_v57, %v139_v55  ;;  %v109_v3 = vld [vmem:[#allocation3 + $0x210] sm:$0xff]  ;;  %v110_v4 = vld [vmem:[#allocation3 + $0x218] sm:$0xff]  ;;  %v812_v6 = vpack.c.bf16 %v158_v62, %v157_v61  ;;  %v127_v8 = vld [vmem:[#allocation3 + $0x2a0] sm:$0xff] }
  0x2f   :  { %393 = vmatprep.mubr.f32.mxu1 %v214_v47  ;;  %v141_v5 = vld [vmem:[#allocation3 + $0x310] sm:$0xff]  ;;  %v142_v7 = vld [vmem:[#allocation3 + $0x318] sm:$0xff]  ;;  %v128_v9 = vld [vmem:[#allocation3 + $0x2a8] sm:$0xff]  ;;  %v782_v12 = vpack.c.bf16 %v110_v4, %v109_v3 }
  0x30   :  { %739 = vmatpush3.bf16.msra.mxu0 %v738_v32  ;;  %v159_v10 = vld [vmem:[#allocation3 + $0x3a0] sm:$0xff]  ;;  %v160_v11 = vld [vmem:[#allocation3 + $0x3a8] sm:$0xff]  ;;  %v814_v13 = vpack.c.bf16 %v142_v7, %v141_v5  ;;  %v784_v14 = vpack.c.bf16 %v128_v9, %v127_v8  ;;  %v129_v20 = vld [vmem:[#allocation3 + $0x2b0] sm:$0xff] }
  0x31   :  { %771 = vmatpush3.bf16.msra.mxu1 %v770_v33  ;;  %741 = vmatprep.subr.bf16.mxu0 %v740_v34  ;;  %v111_v15 = vld [vmem:[#allocation3 + $0x220] sm:$0xff]  ;;  %v112_v16 = vld [vmem:[#allocation3 + $0x228] sm:$0xff]  ;;  %v816_v18 = vpack.c.bf16 %v160_v11, %v159_v10  ;;  %v130_v21 = vld [vmem:[#allocation3 + $0x2b8] sm:$0xff] }
  0x32   :  { %773 = vmatprep.subr.bf16.mxu1 %v772_v42  ;;  %v143_v17 = vld [vmem:[#allocation3 + $0x320] sm:$0xff]  ;;  %v144_v19 = vld [vmem:[#allocation3 + $0x328] sm:$0xff]  ;;  %v161_v23 = vld [vmem:[#allocation3 + $0x3b0] sm:$0xff]  ;;  %v786_v25 = vpack.c.bf16 %v112_v16, %v111_v15  ;;  %v788_v27 = vpack.c.bf16 %v130_v21, %v129_v20 }
  0x33   :  { %v162_v24 = vld [vmem:[#allocation3 + $0x3b8] sm:$0xff]  ;;  %v818_v26 = vpack.c.bf16 %v144_v19, %v143_v17  ;;  %v113_v28 = vld [vmem:[#allocation3 + $0x230] sm:$0xff]  ;;  %v131_v33 = vld [vmem:[#allocation3 + $0x2c0] sm:$0xff] }
  0x34   :  { %743 = vmatpush3.bf16.msra.mxu0 %v742_v50  ;;  %v114_v29 = vld [vmem:[#allocation3 + $0x238] sm:$0xff]  ;;  %v145_v30 = vld [vmem:[#allocation3 + $0x330] sm:$0xff]  ;;  %v820_v31 = vpack.c.bf16 %v162_v24, %v161_v23  ;;  %v132_v34 = vld [vmem:[#allocation3 + $0x2c8] sm:$0xff] }
  0x35   :  { %775 = vmatpush3.bf16.msra.mxu1 %v774_v51  ;;  %777 = vmatprep.subr.bf16.mxu0 %v776_v52  ;;  %v146_v32 = vld [vmem:[#allocation3 + $0x338] sm:$0xff]  ;;  %v115_v35 = vld [vmem:[#allocation3 + $0x240] sm:$0xff]  ;;  %v116_v36 = vld [vmem:[#allocation3 + $0x248] sm:$0xff]  ;;  %v790_v40 = vpack.c.bf16 %v114_v29, %v113_v28  ;;  %v792_v45 = vpack.c.bf16 %v132_v34, %v131_v33 }
  0x36   :  { %809 = vmatprep.subr.bf16.mxu1 %v808_v56  ;;  %v163_v37 = vld [vmem:[#allocation3 + $0x3c0] sm:$0xff]  ;;  %v164_v38 = vld [vmem:[#allocation3 + $0x3c8] sm:$0xff]  ;;  %v133_v42 = vld [vmem:[#allocation3 + $0x2d0] sm:$0xff]  ;;  %v822_v44 = vpack.c.bf16 %v146_v32, %v145_v30  ;;  %v794_v53 = vpack.c.bf16 %v116_v36, %v115_v35 }
  0x37   :  { %324 = vmatmul.mubr.f32.vlgmr.msra.gmra.mrb[0].mxu0 %v211_v60  ;;  %v147_v39 = vld [vmem:[#allocation3 + $0x340] sm:$0xff]  ;;  %v148_v41 = vld [vmem:[#allocation3 + $0x348] sm:$0xff]  ;;  %v134_v43 = vld [vmem:[#allocation3 + $0x2d8] sm:$0xff]  ;;  %v824_v48 = vpack.c.bf16 %v164_v38, %v163_v37 }
  0x38   :  { %394 = vmatmul.mubr.f32.vlgmr.msra.gmra.mrb[0].mxu1 %v213_v63  ;;  %779 = vmatpush3.bf16.msra.mxu0 %v778_v0  ;;  %v165_v46 = vld [vmem:[#allocation3 + $0x3d0] sm:$0xff]  ;;  %v166_v47 = vld [vmem:[#allocation3 + $0x3d8] sm:$0xff]  ;;  %v826_v54 = vpack.c.bf16 %v148_v41, %v147_v39  ;;  %v796_v55 = vpack.c.bf16 %v134_v43, %v133_v42  ;;  %v167_v3 = vld [vmem:[#allocation3 + $0x3e0] sm:$0xff] }
  0x39   :  { %811 = vmatpush3.bf16.msra.mxu1 %v810_v1  ;;  %781 = vmatprep.subr.bf16.mxu0 %v780_v2  ;;  %v853_v49 = vld [vmem:[%s995_s0 + $0x8] ss:$16 sps:$4 sm:$0xff]   ;;  %v857_v51 = vld [vmem:[%s995_s0 + $0xc] ss:$16 sps:$4 sm:$0xff]   ;;  %v117_v57 = vld [vmem:[#allocation3 + $0x250] sm:$0xff]  ;;  %v828_v63 = vpack.c.bf16 %v166_v47, %v165_v46 }
  0x3a   :  { %813 = vmatprep.subr.bf16.mxu1 %v812_v6  ;;  %v855_v50 = vld [vmem:[%s995_s0 + $0x28] ss:$16 sps:$4 sm:$0xff]   ;;  %v858_v52 = vld [vmem:[%s995_s0 + $0x2c] ss:$16 sps:$4 sm:$0xff]   ;;  %v225_v56 = vrot.slane %v853_v49, %v946_v22  ;;  %v149_v59 = vld [vmem:[#allocation3 + $0x350] sm:$0xff]  ;;  %v232_v61 = vrot.slane %v857_v51, %v946_v22 }
  0x3b   :  { %v118_v58 = vld [vmem:[#allocation3 + $0x258] sm:$0xff]  ;;  %v239_v60 = vrot.slane %v855_v50, %v946_v22  ;;  %v246_v62 = vrot.slane %v858_v52, %v946_v22  ;;  %v135_v1 = vld [vmem:[#allocation3 + $0x2e0] sm:$0xff]  ;;  %v136_v2 = vld [vmem:[#allocation3 + $0x2e8] sm:$0xff] }
  0x3c   :  { %783 = vmatpush3.bf16.msra.mxu0 %v782_v12  ;;  %v150_v0 = vld [vmem:[#allocation3 + $0x358] sm:$0xff]  ;;  %v168_v4 = vld [vmem:[#allocation3 + $0x3e8] sm:$0xff]  ;;  %v798_v7 = vpack.c.bf16 %v118_v58, %v117_v57  ;;  %v800_v9 = vpack.c.bf16 %v136_v2, %v135_v1  ;;  %v119_v10 = vld [vmem:[#allocation3 + $0x260] sm:$0xff] }
  0x3d   :  { %815 = vmatpush3.bf16.msra.mxu1 %v814_v13  ;;  %785 = vmatprep.subr.bf16.mxu0 %v784_v14  ;;  %v248_v5 = vcombine.high %v225_v56, %v239_v60  ;;  %v250_v6 = vcombine.high %v232_v61, %v246_v62  ;;  %v830_v8 = vpack.c.bf16 %v150_v0, %v149_v59  ;;  %v120_v11 = vld [vmem:[#allocation3 + $0x268] sm:$0xff]  ;;  %v151_v12 = vld [vmem:[#allocation3 + $0x360] sm:$0xff]  ;;  %v137_v14 = vld [vmem:[#allocation3 + $0x2f0] sm:$0xff] }
  0x3e   :  { %817 = vmatprep.subr.bf16.mxu1 %v816_v18  ;;  %v832_v22 = vpack.c.bf16 %v168_v4, %v167_v3  ;;  %v152_v13 = vld [vmem:[#allocation3 + $0x368] sm:$0xff]  ;;  %v138_v15 = vld [vmem:[#allocation3 + $0x2f8] sm:$0xff]  ;;  %v169_v16 = vld [vmem:[#allocation3 + $0x3f0] sm:$0xff]  ;;  %v802_v18 = vpack.c.bf16 %v120_v11, %v119_v10  ;;  %v247_v29 = vcombine.low %v225_v56, %v239_v60  ;;  %v249_v30 = vcombine.low %v232_v61, %v246_v62 }
  0x3f   :  { %463 = vmatprep.mubr.f32.mxu0 %v248_v5  ;;  %v170_v17 = vld [vmem:[#allocation3 + $0x3f8] sm:$0xff]  ;;  %533 = vmatprep.mubr.f32.mxu1 %v250_v6  ;;  %v834_v19 = vpack.c.bf16 %v152_v13, %v151_v12  ;;  %v804_v20 = vpack.c.bf16 %v138_v15, %v137_v14  ;;  %v121_v21 = vld [vmem:[#allocation3 + $0x270] sm:$0xff] }
  0x40   :  { %787 = vmatpush3.bf16.msra.mxu0 %v786_v25  ;;  %v122_v23 = vld [vmem:[#allocation3 + $0x278] sm:$0xff]  ;;  %v836_v24 = vpack.c.bf16 %v170_v17, %v169_v16  ;;  %v153_v25 = vld [vmem:[#allocation3 + $0x370] sm:$0xff] }
  0x41   :  { %819 = vmatpush3.bf16.msra.mxu1 %v818_v26  ;;  %789 = vmatprep.subr.bf16.mxu0 %v788_v27  ;;  %v154_v26 = vld [vmem:[#allocation3 + $0x378] sm:$0xff]  ;;  %v806_v27 = vpack.c.bf16 %v122_v23, %v121_v21 }
  0x42   :  { %821 = vmatprep.subr.bf16.mxu1 %v820_v31  ;;  %v838_v28 = vpack.c.bf16 %v154_v26, %v153_v25 }
  0x44   :  { %791 = vmatpush3.bf16.msra.mxu0 %v790_v40 }
  0x45   :  { %823 = vmatpush3.bf16.msra.mxu1 %v822_v44  ;;  %793 = vmatprep.subr.bf16.mxu0 %v792_v45  ;;  %v571_v45 = vld [vmem:[%s997_s2] ss:$0 sm:$0xff] }
  0x46   :  { %825 = vmatprep.subr.bf16.mxu1 %v824_v48 }
  0x48   :  { %795 = vmatpush3.bf16.msra.mxu0 %v794_v53 }
  0x49   :  { %827 = vmatpush3.bf16.msra.mxu1 %v826_v54  ;;  %797 = vmatprep.subr.bf16.mxu0 %v796_v55 }
  0x4a   :  { %829 = vmatprep.subr.bf16.mxu1 %v828_v63 }
  0x4c   :  { %799 = vmatpush3.bf16.msra.mxu0 %v798_v7 }
  0x4d   :  { %831 = vmatpush3.bf16.msra.mxu1 %v830_v8  ;;  %801 = vmatprep.subr.bf16.mxu0 %v800_v9 }
  0x4e   :  { %833 = vmatprep.subr.bf16.mxu1 %v832_v22 }
  0x50   :  { %803 = vmatpush3.bf16.msra.mxu0 %v802_v18 }
  0x51   :  { %835 = vmatpush3.bf16.msra.mxu1 %v834_v19  ;;  %805 = vmatprep.subr.bf16.mxu0 %v804_v20 }
  0x52   :  { %837 = vmatprep.subr.bf16.mxu1 %v836_v24 }
  0x54   :  { %807 = vmatpush3.bf16.msra.mxu0 %v806_v27 }
  0x55   :  { %839 = vmatpush3.bf16.msra.mxu1 %v838_v28 }
  0x57   :  { %464 = vmatmul.mubr.f32.vlgmr.msra.gmra.mrb[2].mxu0 %v247_v29 }
  0x58   :  { %534 = vmatmul.mubr.f32.vlgmr.msra.gmra.mrb[2].mxu1 %v249_v30 }
 0x10a   :  { %v604_v31 = vpop.f32.mrb[0].mxu0 }
 0x10b   :  { %v639_v32 = vpop.f32.mrb[0].mxu1  ;;  %v605_v33 = vpop.f32.mrb[1].mxu0 }
 0x10c   :  { %v606_v34 = vadd.f32 %v605_v33, %v604_v31  ;;  %v640_v35 = vpop.f32.mrb[1].mxu1 }
 0x10d   :  { %v641_v36 = vadd.f32 %v640_v35, %v639_v32 }
 0x10f   :  { %v396_v37 = vadd.f32 %v641_v36, %v606_v34 }
 0x12a   :  { %v674_v38 = vpop.f32.mrb[2].mxu0 }
 0x12b   :  { %v675_v39 = vpop.f32.mrb[3].mxu0  ;;  %v709_v40 = vpop.f32.mrb[2].mxu1 }
 0x12c   :  { %v676_v41 = vadd.f32 %v675_v39, %v674_v38  ;;  %v710_v42 = vpop.f32.mrb[3].mxu1 }
 0x12d   :  { %v711_v43 = vadd.f32 %v710_v42, %v709_v40 }
 0x12e   :  { %v466_v44 = vadd.f32 %v676_v41, %v396_v37 }
 0x130   :  { %v536_v46 = vadd.f32 %v711_v43, %v466_v44 }
 0x132   :  { %v552_v47 = vadd.f32 %v571_v45, %v536_v46 }
 0x134   :  { %553 = vst [vmem:[#allocation6] sm:$0xff] %v552_v47 }
 0x135   :  { %558 = vsyncadd [#allocation5], 96  ;;  %s911_s15 = smov [#allocation6]  }
 0x136   :  { %s559_s16 = sshll.u32 %s911_s15, 4  ;;  %s560_s16 = int_to_ptr.vmem [resolvable:$true] %s559_s16 }
 0x137   :  { %s881_s17 = scalar_lea.vmem %s560_s16, 32  ;;  %s885_s18 = scalar_lea.vmem %s560_s16, 128 }
 0x138   :  { %p882_p8 = scmp.ne.s32.totalorder %s560_s16, %s881_s17  ;;  %p886_p9 = scmp.lt.s32.totalorder %s560_s16, %s560_s16 }
 0x139   :  { %p887_p10 = scmp.lt.s32.totalorder %s885_s18, %s881_s17 }
 0x13b   :  { %p888_p11 = por %p887_p10, %p886_p9 }
 0x13d   :  { %p889_p12 = pnand %p888_p11, %p882_p8 }
 0x13f   :  { %892 = shalt.err (!%p889_p12)
}
 0x140   :  { %s893_s21 = scalar_lea.hbm %s998_s3, 32 }
 0x141   :  { %p894_p13 = scmp.ne.s32.totalorder %s998_s3, %s893_s21  ;;  %p897_p0 = scmp.lt.u32.totalorder %s893_s21, %s998_s3 }
 0x143   :  { %p899_p1 = pnand %p897_p0, %p894_p13 }
 0x145   :  { %902 = shalt.err (!%p899_p1)
}
 0x146   :  { %s912_s25 = smov 32   ;;  %s913_s1 = smov 2  }
 0x147   :  { %565 = dma.vmem_to_hbm [thread:$0]  %s560_s16, 32, %s998_s3, [#allocation5], %s912_s25, %s912_s25, %s913_s1  }
 0x148   :  { %905 = dma.done.wait [#allocation5], 128  }
 0x149   :  { %906 = vsyncadd [#allocation5], 4294967168 }
 0x14a   :  { %569 = vsyncpa [#allocation4], 1 }
 0x14b   :  { %570 = vsyncpa [#allocation5], 1 }

</bundles_post_ra>
